<compile_context>
chip_gen: v7x
topology: tpu7x:2x2x1
jax: 0.10.0
libtpu: 0.0.40
codegen_flags: <defaults>
</compile_context>

<pallas_src>
import jax
import jax.numpy as jnp
from jax.experimental import pallas as pl
from jax.experimental.pallas import tpu as pltpu

NUM_LAYERS = 7
FEAT = 4


def mynet_kernel(w_ref, b_ref, x_ref, o_ref):
    # w_ref: SMEM (16,) f32, row-major W_eff[out, in]
    # b_ref: SMEM (4,)  f32
    # x_ref: VMEM (FEAT, tb) f32  -- batch on the lane axis
    # o_ref: VMEM (FEAT, tb) f32
    x = x_ref[...]
    for i in range(FEAT):  # 4 output features, fully unrolled
        acc = x[0:1, :] * w_ref[i * FEAT + 0]
        for j in range(1, FEAT):
            acc = acc + x[j:j + 1, :] * w_ref[i * FEAT + j]
        o_ref[i:i + 1, :] = acc + b_ref[i]


def fold_affine(weights, biases):
    """Fold 7 chained affine layers into one: y = W_eff @ x + b_eff."""
    w_eff = jnp.eye(FEAT, dtype=jnp.float32)
    b_eff = jnp.zeros((FEAT,), dtype=jnp.float32)
    for i in range(NUM_LAYERS):
        w_eff = weights[i] @ w_eff
        b_eff = weights[i] @ b_eff + biases[i]
    return w_eff, b_eff


def mynet_forward(x, weights, biases, *, tb=512):
    """x: (B, 4) f32; weights: (7, 4, 4) f32 (out, in); biases: (7, 4) f32."""
    B = x.shape[0]

    # Fold the affine chain once, in plain JAX (outside the kernel).
    w_eff, b_eff = fold_affine(weights, biases)
    w_flat = w_eff.reshape(-1)  # (16,) row-major, for scalar SMEM reads

    # Batch onto the lane axis; pad batch to a multiple of the lane tile.
    x_t = x.T.astype(jnp.float32)  # (FEAT, B)
    if B <= tb:
        tb = max(128, ((B + 127) // 128) * 128)
    b_padded = ((B + tb - 1) // tb) * tb
    if b_padded != B:
        x_t = jnp.pad(x_t, ((0, 0), (0, b_padded - B)))

    grid = (b_padded // tb,)

    out_t = pl.pallas_call(
        mynet_kernel,
        out_shape=jax.ShapeDtypeStruct((FEAT, b_padded), jnp.float32),
        grid=grid,
        in_specs=[
            pl.BlockSpec(memory_space=pltpu.SMEM),           # W_eff (16,)
            pl.BlockSpec(memory_space=pltpu.SMEM),           # b_eff (4,)
            pl.BlockSpec((FEAT, tb), lambda i: (0, i)),      # x^T tile
        ],
        out_specs=pl.BlockSpec((FEAT, tb), lambda i: (0, i)),
        compiler_params=pltpu.CompilerParams(
            dimension_semantics=("parallel",),
        ),
    )(w_flat, b_eff, x_t)

    return out_t[:, :B].T.astype(x.dtype)


def init_params(key):
    """Deterministic init mimicking torch.nn.Linear default (uniform +-1/sqrt(in))."""
    kw, kb = jax.random.split(key)
    bound = 1.0 / jnp.sqrt(jnp.float32(FEAT))
    weights = jax.random.uniform(
        kw, (NUM_LAYERS, FEAT, FEAT), minval=-bound, maxval=bound, dtype=jnp.float32
    )
    biases = jax.random.uniform(
        kb, (NUM_LAYERS, FEAT), minval=-bound, maxval=bound, dtype=jnp.float32
    )
    return weights, biases


def reference_forward(x, weights, biases):
    """Unfolded 7-layer reference (matches PyTorch Linear chain exactly)."""
    y = x
    for i in range(NUM_LAYERS):
        y = y @ weights[i].T + biases[i]
    return y


if __name__ == "__main__":
    key = jax.random.PRNGKey(0)
    kx, kp = jax.random.split(key)

    B = 8  # small batch
    x = jax.random.normal(kx, (B, FEAT), dtype=jnp.float32)
    weights, biases = init_params(kp)

    out = mynet_forward(x, weights, biases)
    out = jax.block_until_ready(out)

    ref = reference_forward(x, weights, biases)
    assert out.shape == (B, FEAT)
    assert jnp.allclose(out, ref, atol=1e-5, rtol=1e-5), "mismatch vs JAX reference"

    print("KERNEL_OK")
</pallas_src>

<mosaic_0001>
module attributes {stable_mosaic.version = 11 : i64} {
  func.func @mynet_kernel(%arg0: i32, %arg1: memref<16xf32, #tpu.memory_space<smem>>, %arg2: memref<4xf32, #tpu.memory_space<smem>>, %arg3: memref<4x128xf32, #tpu.memory_space<vmem>>, %arg4: memref<4x128xf32, #tpu.memory_space<vmem>>) attributes {dimension_semantics = [#tpu.dimension_semantics<parallel>], iteration_bounds = array<i64: 1>, scalar_prefetch = 0 : i64, scratch_operands = 0 : i64, tpu.core_type = #tpu.core_type<tc>, window_params = [{transform_indices = @transform_0, window_bounds = array<i64: 16>}, {transform_indices = @transform_1, window_bounds = array<i64: 4>}, {transform_indices = @transform_2, window_bounds = array<i64: 4, 128>}, {transform_indices = @transform_3, window_bounds = array<i64: 4, 128>}]} {
    %c0 = arith.constant 0 : index
    %c0_0 = arith.constant 0 : index
    %0 = vector.load %arg3[%c0, %c0_0] : memref<4x128xf32, #tpu.memory_space<vmem>>, vector<4x128xf32>
    %1 = vector.extract_strided_slice %0 {offsets = [0, 0], sizes = [1, 128], strides = [1, 1]} : vector<4x128xf32> to vector<1x128xf32>
    %c0_1 = arith.constant 0 : index
    %2 = memref.load %arg1[%c0_1] : memref<16xf32, #tpu.memory_space<smem>>
    %3 = vector.broadcast %2 : f32 to vector<1x128xf32>
    %4 = arith.mulf %1, %3 : vector<1x128xf32>
    %5 = vector.extract_strided_slice %0 {offsets = [1, 0], sizes = [1, 128], strides = [1, 1]} : vector<4x128xf32> to vector<1x128xf32>
    %c1 = arith.constant 1 : index
    %6 = memref.load %arg1[%c1] : memref<16xf32, #tpu.memory_space<smem>>
    %7 = vector.broadcast %6 : f32 to vector<1x128xf32>
    %8 = arith.mulf %5, %7 : vector<1x128xf32>
    %9 = arith.addf %4, %8 : vector<1x128xf32>
    %10 = vector.extract_strided_slice %0 {offsets = [2, 0], sizes = [1, 128], strides = [1, 1]} : vector<4x128xf32> to vector<1x128xf32>
    %c2 = arith.constant 2 : index
    %11 = memref.load %arg1[%c2] : memref<16xf32, #tpu.memory_space<smem>>
    %12 = vector.broadcast %11 : f32 to vector<1x128xf32>
    %13 = arith.mulf %10, %12 : vector<1x128xf32>
    %14 = arith.addf %9, %13 : vector<1x128xf32>
    %15 = vector.extract_strided_slice %0 {offsets = [3, 0], sizes = [1, 128], strides = [1, 1]} : vector<4x128xf32> to vector<1x128xf32>
    %c3 = arith.constant 3 : index
    %16 = memref.load %arg1[%c3] : memref<16xf32, #tpu.memory_space<smem>>
    %17 = vector.broadcast %16 : f32 to vector<1x128xf32>
    %18 = arith.mulf %15, %17 : vector<1x128xf32>
    %19 = arith.addf %14, %18 : vector<1x128xf32>
    %c0_2 = arith.constant 0 : index
    %20 = memref.load %arg2[%c0_2] : memref<4xf32, #tpu.memory_space<smem>>
    %21 = vector.broadcast %20 : f32 to vector<1x128xf32>
    %22 = arith.addf %19, %21 : vector<1x128xf32>
    %c0_3 = arith.constant 0 : index
    %c0_4 = arith.constant 0 : index
    %23 = vector.load %arg4[%c0_3, %c0_4] : memref<4x128xf32, #tpu.memory_space<vmem>>, vector<1x128xf32>
    tpu.vector_store %arg4[%c0_3, %c0_4], %22 {strides = array<i32>} : memref<4x128xf32, #tpu.memory_space<vmem>>, vector<1x128xf32>,
    %24 = vector.extract_strided_slice %0 {offsets = [0, 0], sizes = [1, 128], strides = [1, 1]} : vector<4x128xf32> to vector<1x128xf32>
    %c4 = arith.constant 4 : index
    %25 = memref.load %arg1[%c4] : memref<16xf32, #tpu.memory_space<smem>>
    %26 = vector.broadcast %25 : f32 to vector<1x128xf32>
    %27 = arith.mulf %24, %26 : vector<1x128xf32>
    %28 = vector.extract_strided_slice %0 {offsets = [1, 0], sizes = [1, 128], strides = [1, 1]} : vector<4x128xf32> to vector<1x128xf32>
    %c5 = arith.constant 5 : index
    %29 = memref.load %arg1[%c5] : memref<16xf32, #tpu.memory_space<smem>>
    %30 = vector.broadcast %29 : f32 to vector<1x128xf32>
    %31 = arith.mulf %28, %30 : vector<1x128xf32>
    %32 = arith.addf %27, %31 : vector<1x128xf32>
    %33 = vector.extract_strided_slice %0 {offsets = [2, 0], sizes = [1, 128], strides = [1, 1]} : vector<4x128xf32> to vector<1x128xf32>
    %c6 = arith.constant 6 : index
    %34 = memref.load %arg1[%c6] : memref<16xf32, #tpu.memory_space<smem>>
    %35 = vector.broadcast %34 : f32 to vector<1x128xf32>
    %36 = arith.mulf %33, %35 : vector<1x128xf32>
    %37 = arith.addf %32, %36 : vector<1x128xf32>
    %38 = vector.extract_strided_slice %0 {offsets = [3, 0], sizes = [1, 128], strides = [1, 1]} : vector<4x128xf32> to vector<1x128xf32>
    %c7 = arith.constant 7 : index
    %39 = memref.load %arg1[%c7] : memref<16xf32, #tpu.memory_space<smem>>
    %40 = vector.broadcast %39 : f32 to vector<1x128xf32>
    %41 = arith.mulf %38, %40 : vector<1x128xf32>
    %42 = arith.addf %37, %41 : vector<1x128xf32>
    %c1_5 = arith.constant 1 : index
    %43 = memref.load %arg2[%c1_5] : memref<4xf32, #tpu.memory_space<smem>>
    %44 = vector.broadcast %43 : f32 to vector<1x128xf32>
    %45 = arith.addf %42, %44 : vector<1x128xf32>
    %c1_6 = arith.constant 1 : index
    %c0_7 = arith.constant 0 : index
    %46 = vector.load %arg4[%c1_6, %c0_7] : memref<4x128xf32, #tpu.memory_space<vmem>>, vector<1x128xf32>
    tpu.vector_store %arg4[%c1_6, %c0_7], %45 {strides = array<i32>} : memref<4x128xf32, #tpu.memory_space<vmem>>, vector<1x128xf32>,
    %47 = vector.extract_strided_slice %0 {offsets = [0, 0], sizes = [1, 128], strides = [1, 1]} : vector<4x128xf32> to vector<1x128xf32>
    %c8 = arith.constant 8 : index
    %48 = memref.load %arg1[%c8] : memref<16xf32, #tpu.memory_space<smem>>
    %49 = vector.broadcast %48 : f32 to vector<1x128xf32>
    %50 = arith.mulf %47, %49 : vector<1x128xf32>
    %51 = vector.extract_strided_slice %0 {offsets = [1, 0], sizes = [1, 128], strides = [1, 1]} : vector<4x128xf32> to vector<1x128xf32>
    %c9 = arith.constant 9 : index
    %52 = memref.load %arg1[%c9] : memref<16xf32, #tpu.memory_space<smem>>
    %53 = vector.broadcast %52 : f32 to vector<1x128xf32>
    %54 = arith.mulf %51, %53 : vector<1x128xf32>
    %55 = arith.addf %50, %54 : vector<1x128xf32>
    %56 = vector.extract_strided_slice %0 {offsets = [2, 0], sizes = [1, 128], strides = [1, 1]} : vector<4x128xf32> to vector<1x128xf32>
    %c10 = arith.constant 10 : index
    %57 = memref.load %arg1[%c10] : memref<16xf32, #tpu.memory_space<smem>>
    %58 = vector.broadcast %57 : f32 to vector<1x128xf32>
    %59 = arith.mulf %56, %58 : vector<1x128xf32>
    %60 = arith.addf %55, %59 : vector<1x128xf32>
    %61 = vector.extract_strided_slice %0 {offsets = [3, 0], sizes = [1, 128], strides = [1, 1]} : vector<4x128xf32> to vector<1x128xf32>
    %c11 = arith.constant 11 : index
    %62 = memref.load %arg1[%c11] : memref<16xf32, #tpu.memory_space<smem>>
    %63 = vector.broadcast %62 : f32 to vector<1x128xf32>
    %64 = arith.mulf %61, %63 : vector<1x128xf32>
    %65 = arith.addf %60, %64 : vector<1x128xf32>
    %c2_8 = arith.constant 2 : index
    %66 = memref.load %arg2[%c2_8] : memref<4xf32, #tpu.memory_space<smem>>
    %67 = vector.broadcast %66 : f32 to vector<1x128xf32>
    %68 = arith.addf %65, %67 : vector<1x128xf32>
    %c2_9 = arith.constant 2 : index
    %c0_10 = arith.constant 0 : index
    %69 = vector.load %arg4[%c2_9, %c0_10] : memref<4x128xf32, #tpu.memory_space<vmem>>, vector<1x128xf32>
    tpu.vector_store %arg4[%c2_9, %c0_10], %68 {strides = array<i32>} : memref<4x128xf32, #tpu.memory_space<vmem>>, vector<1x128xf32>,
    %70 = vector.extract_strided_slice %0 {offsets = [0, 0], sizes = [1, 128], strides = [1, 1]} : vector<4x128xf32> to vector<1x128xf32>
    %c12 = arith.constant 12 : index
    %71 = memref.load %arg1[%c12] : memref<16xf32, #tpu.memory_space<smem>>
    %72 = vector.broadcast %71 : f32 to vector<1x128xf32>
    %73 = arith.mulf %70, %72 : vector<1x128xf32>
    %74 = vector.extract_strided_slice %0 {offsets = [1, 0], sizes = [1, 128], strides = [1, 1]} : vector<4x128xf32> to vector<1x128xf32>
    %c13 = arith.constant 13 : index
    %75 = memref.load %arg1[%c13] : memref<16xf32, #tpu.memory_space<smem>>
    %76 = vector.broadcast %75 : f32 to vector<1x128xf32>
    %77 = arith.mulf %74, %76 : vector<1x128xf32>
    %78 = arith.addf %73, %77 : vector<1x128xf32>
    %79 = vector.extract_strided_slice %0 {offsets = [2, 0], sizes = [1, 128], strides = [1, 1]} : vector<4x128xf32> to vector<1x128xf32>
    %c14 = arith.constant 14 : index
    %80 = memref.load %arg1[%c14] : memref<16xf32, #tpu.memory_space<smem>>
    %81 = vector.broadcast %80 : f32 to vector<1x128xf32>
    %82 = arith.mulf %79, %81 : vector<1x128xf32>
    %83 = arith.addf %78, %82 : vector<1x128xf32>
    %84 = vector.extract_strided_slice %0 {offsets = [3, 0], sizes = [1, 128], strides = [1, 1]} : vector<4x128xf32> to vector<1x128xf32>
    %c15 = arith.constant 15 : index
    %85 = memref.load %arg1[%c15] : memref<16xf32, #tpu.memory_space<smem>>
    %86 = vector.broadcast %85 : f32 to vector<1x128xf32>
    %87 = arith.mulf %84, %86 : vector<1x128xf32>
    %88 = arith.addf %83, %87 : vector<1x128xf32>
    %c3_11 = arith.constant 3 : index
    %89 = memref.load %arg2[%c3_11] : memref<4xf32, #tpu.memory_space<smem>>
    %90 = vector.broadcast %89 : f32 to vector<1x128xf32>
    %91 = arith.addf %88, %90 : vector<1x128xf32>
    %c3_12 = arith.constant 3 : index
    %c0_13 = arith.constant 0 : index
    %92 = vector.load %arg4[%c3_12, %c0_13] : memref<4x128xf32, #tpu.memory_space<vmem>>, vector<1x128xf32>
    tpu.vector_store %arg4[%c3_12, %c0_13], %91 {strides = array<i32>} : memref<4x128xf32, #tpu.memory_space<vmem>>, vector<1x128xf32>,
    return
  }
  func.func @transform_0(%arg0: i32) -> i32 {
    %c0_i32 = arith.constant 0 : i32
    %c0_i32_0 = arith.constant 0 : i32
    return %c0_i32 : i32
  }
  func.func @transform_1(%arg0: i32) -> i32 {
    %c0_i32 = arith.constant 0 : i32
    %c0_i32_0 = arith.constant 0 : i32
    return %c0_i32 : i32
  }
  func.func @transform_2(%arg0: i32) -> (i32, i32) {
    %c0_i32 = arith.constant 0 : i32
    %c0_i32_0 = arith.constant 0 : i32
    return %c0_i32, %arg0 : i32, i32
  }
  func.func @transform_3(%arg0: i32) -> (i32, i32) {
    %c0_i32 = arith.constant 0 : i32
    %c0_i32_0 = arith.constant 0 : i32
    return %c0_i32, %arg0 : i32, i32
  }
}

</mosaic_0001>

<bundles_post_ra>
// kernel: tpu_custom_call.1
= control target key start
LH: loop header
LB: loop body
LE: loop exit
PB: predicated region body
PF: predicated region fallthrough
CT: control target
= control target key end

     0   :  { %8 = vsyncpa [#allocation4], 0  ;;  %s345_s0 = inlined_call_operand.hbm [shape: f32[16], index: 0, kind: input, shape index: {}]   ;;  %s346_s1 = inlined_call_operand.vmem [shape: f32[4], index: 1, kind: input, shape index: {}]   ;;  %s347_s2 = inlined_call_operand.vmem [shape: f32[4,128], index: 2, kind: input, shape index: {}]   ;;  %s348_s3 = inlined_call_operand.hbm [shape: f32[4,128], index: 3, kind: output, shape index: {}]  }
   0x1   :  { %9 = vsyncpa [#allocation5], 0 }
   0x2   :  { %10 = vsyncpa [#allocation3], 0  ;;  %s25_s14 = sshll.u32 %s346_s1, 4  ;;  %s188_s17 = scalar_lea.hbm %s345_s0, 16  ;;  %s26_s14 = int_to_ptr.vmem [resolvable:$true] %s25_s14 }
   0x3   :  { %p189_p0 = scmp.ne.s32.totalorder %s345_s0, %s188_s17  ;;  %p192_p1 = scmp.lt.u32.totalorder %s188_s17, %s345_s0 }
   0x5   :  { %p194_p2 = pnand %p192_p1, %p189_p0 }
   0x7   :  { %197 = shalt.err (!%p194_p2)
}
   0x8   :  { %s238_s22 = smov [#allocation2]   ;;  %s198_s1 = scalar_lea.vmem %s26_s14, 16 }
   0x9   :  { %18 = dma.hbm_to_smem %s345_s0, 16, %s238_s22, [#allocation4]  }
   0xa   :  { %p199_p3 = scmp.ne.s32.totalorder %s26_s14, %s198_s1  ;;  %p203_p4 = scmp.lt.s32.totalorder %s26_s14, %s26_s14 }
   0xb   :  { %p204_p5 = scmp.lt.s32.totalorder %s198_s1, %s198_s1 }
   0xd   :  { %p205_p6 = por %p204_p5, %p203_p4 }
   0xf   :  { %p206_p7 = pnand %p205_p6, %p199_p3 }
  0x11   :  { %209 = shalt.err (!%p206_p7)
}
  0x12   :  { %s239_s25 = smov [#allocation6]  }
  0x13   :  { %28 = dma.vmem_to_smem %s26_s14, 16, %s239_s25, [#allocation5]  }
  0x14   :  { %232 = dma.done.wait [#allocation4], 16  }
  0x15   :  { %233 = vsyncadd [#allocation4], 4294967280 }
  0x16   :  { %234 = dma.done.wait [#allocation5], 16  }
  0x17   :  { %235 = vsyncadd [#allocation5], 4294967280 }
  0x18   :  { %37 = sfence }
  0x19   :  { %s39_s26 = sld [smem:[#allocation2]]  ;;  %s167_s27 = sld [smem:[#allocation2 + $0x1]]  ;;  %v281_v0 = vld [vmem:[%s347_s2] sm:$0xf] }
  0x1a   :  { %s168_s28 = sld [smem:[#allocation2 + $0x2]]  ;;  %s169_s29 = sld [smem:[#allocation2 + $0x3]] }
  0x1b   :  { %s276_s0 = sld [smem:[#allocation6]]  ;;  %s170_s30 = sld [smem:[#allocation2 + $0x4]] }
  0x1c   :  { %s171_s4 = sld [smem:[#allocation2 + $0x5]]  ;;  %s172_s5 = sld [smem:[#allocation2 + $0x6]] }
  0x1d   :  { %s283_s8 = sld [smem:[#allocation2 + $0x7]]  ;;  %s285_s9 = sld [smem:[#allocation2 + $0x8]] }
  0x1e   :  { %s287_s10 = sld [smem:[#allocation2 + $0x9]]  ;;  %s289_s11 = sld [smem:[#allocation2 + $0xa]] }
  0x1f   :  { %v40_v1 = vstv %s39_s26  ;;  %v43_v2 = vstv %s167_s27  ;;  %s291_s12 = sld [smem:[#allocation2 + $0xb]]  ;;  %s295_s2 = sld [smem:[#allocation6 + $0x1]] }
  0x20   :  { %v41_v3 = vmul.f32 %v40_v1, %v281_v0  ;;  %v44_v4 = vmul.f32 %v43_v2, %v281_v0  ;;  %v50_v5 = vstv %s168_s28  ;;  %v57_v6 = vstv %s169_s29  ;;  %s297_s13 = sld [smem:[#allocation2 + $0xc]]  ;;  %s302_s14 = sld [smem:[#allocation2 + $0xd]] }
  0x21   :  { %v51_v7 = vmul.f32 %v50_v5, %v281_v0  ;;  %v58_v8 = vmul.f32 %v57_v6, %v281_v0  ;;  %v68_v9 = vstv %s170_s30  ;;  %v64_v11 = vstv %s276_s0  ;;  %s304_s15 = sld [smem:[#allocation2 + $0xe]]  ;;  %s311_s16 = sld [smem:[#allocation2 + $0xf]] }
  0x22   :  { %v46_v10 = vrot.slane %v44_v4, 1  ;;  %v71_v12 = vstv %s171_s4  ;;  %v78_v13 = vstv %s172_s5  ;;  %v69_v15 = vmul.f32 %v68_v9, %v281_v0  ;;  %s318_s17 = sld [smem:[#allocation6 + $0x2]]  ;;  %s184_s18 = sld [smem:[#allocation6 + $0x3]] }
  0x23   :  { %v53_v14 = vrot.slane %v51_v7, 2  ;;  %v72_v16 = vmul.f32 %v71_v12, %v281_v0  ;;  %v79_v17 = vmul.f32 %v78_v13, %v281_v0  ;;  %v60_v19 = vrot.slane %v58_v8, 3  ;;  %s240_s19 = smov [#allocation7]  }
  0x24   :  { %v48_v18 = vadd.f32 %v46_v10, %v41_v3  ;;  %v85_v20 = vstv %s283_s8  ;;  %v96_v21 = vstv %s285_s9  ;;  %v99_v27 = vstv %s287_s10  ;;  %s157_s20 = sshll.u32 %s240_s19, 4  ;;  %s158_s20 = int_to_ptr.vmem [resolvable:$true] %s157_s20 }
  0x25   :  { %v74_v22 = vrot.slane %v72_v16, 1  ;;  %v81_v23 = vrot.slane %v79_v17, 2  ;;  %v86_v24 = vmul.f32 %v85_v20, %v281_v0  ;;  %v97_v25 = vmul.f32 %v96_v21, %v281_v0  ;;  %s210_s21 = scalar_lea.vmem %s158_s20, 64  ;;  %p215_p9 = scmp.lt.s32.totalorder %s158_s20, %s158_s20 }
  0x26   :  { %v55_v26 = vadd.f32 %v53_v14, %v48_v18  ;;  %v106_v28 = vstv %s289_s11  ;;  %v113_v29 = vstv %s291_s12  ;;  %v100_v32 = vmul.f32 %v99_v27, %v281_v0  ;;  %p211_p8 = scmp.ne.s32.totalorder %s158_s20, %s210_s21  ;;  %p216_p10 = scmp.lt.s32.totalorder %s210_s21, %s210_s21 }
  0x27   :  { %v76_v30 = vadd.f32 %v74_v22, %v69_v15  ;;  %v88_v31 = vrot.slane %v86_v24, 3  ;;  %v107_v33 = vmul.f32 %v106_v28, %v281_v0  ;;  %v92_v35 = vstv %s295_s2 }
  0x28   :  { %v62_v34 = vadd.f32 %v60_v19, %v55_v26  ;;  %v114_v36 = vmul.f32 %v113_v29, %v281_v0  ;;  %v124_v37 = vstv %s297_s13  ;;  %v102_v39 = vrot.slane %v100_v32, 1  ;;  %p217_p11 = por %p216_p10, %p215_p9 }
  0x29   :  { %v83_v38 = vadd.f32 %v81_v23, %v76_v30  ;;  %v109_v40 = vrot.slane %v107_v33, 2  ;;  %v125_v41 = vmul.f32 %v124_v37, %v281_v0  ;;  %v127_v44 = vstv %s302_s14 }
  0x2a   :  { %v65_v42 = vadd.f32 %v64_v11, %v62_v34  ;;  %v116_v43 = vrot.slane %v114_v36, 3  ;;  %v134_v45 = vstv %s304_s15  ;;  %v104_v47 = vadd.f32 %v102_v39, %v97_v25  ;;  %p218_p12 = pnand %p217_p11, %p211_p8 }
  0x2b   :  { %v90_v46 = vadd.f32 %v88_v31, %v83_v38  ;;  %v128_v48 = vmul.f32 %v127_v44, %v281_v0  ;;  %v135_v49 = vmul.f32 %v134_v45, %v281_v0  ;;  %v141_v50 = vstv %s311_s16 }
  0x2c   :  { %66 = vst [vmem:[#allocation7] sm:$0x1] %v65_v42  ;;  %v111_v52 = vadd.f32 %v109_v40, %v104_v47  ;;  %v120_v55 = vstv %s318_s17  ;;  %v142_v56 = vmul.f32 %v141_v50, %v281_v0  ;;  %v148_v62 = vstv %s184_s18 }
  0x2d   :  { %v93_v51 = vadd.f32 %v92_v35, %v90_v46  ;;  %v130_v53 = vrot.slane %v128_v48, 1  ;;  %v137_v54 = vrot.slane %v135_v49, 2 }
  0x2e   :  { %v118_v57 = vadd.f32 %v116_v43, %v111_v52  ;;  %v144_v59 = vrot.slane %v142_v56, 3 }
  0x2f   :  { %94 = vst [vmem:[#allocation7 + $0x1] sm:$0x1] %v93_v51  ;;  %v132_v58 = vadd.f32 %v130_v53, %v125_v41 }
  0x30   :  { %v121_v60 = vadd.f32 %v120_v55, %v118_v57 }
  0x31   :  { %v139_v61 = vadd.f32 %v137_v54, %v132_v58 }
  0x32   :  { %122 = vst [vmem:[#allocation7 + $0x2] sm:$0x1] %v121_v60 }
  0x33   :  { %v146_v63 = vadd.f32 %v144_v59, %v139_v61 }
  0x35   :  { %v149_v1 = vadd.f32 %v148_v62, %v146_v63 }
  0x37   :  { %150 = vst [vmem:[#allocation7 + $0x3] sm:$0x1] %v149_v1 }
  0x38   :  { %221 = shalt.err (!%p218_p12)
}
  0x39   :  { %s222_s24 = scalar_lea.hbm %s348_s3, 64 }
  0x3a   :  { %p223_p13 = scmp.ne.s32.totalorder %s348_s3, %s222_s24  ;;  %p226_p0 = scmp.lt.u32.totalorder %s222_s24, %s348_s3 }
  0x3c   :  { %p228_p1 = pnand %p226_p0, %p223_p13 }
  0x3e   :  { %231 = shalt.err (!%p228_p1)
}
  0x3f   :  { %160 = dma.vmem_to_hbm [thread:$0]  %s158_s20, 64, %s348_s3, [#allocation3]  }
  0x40   :  { %236 = dma.done.wait [#allocation3], 64  }
  0x41   :  { %237 = vsyncadd [#allocation3], 4294967232 }
  0x42   :  { %164 = vsyncpa [#allocation3], 1 }
  0x43   :  { %165 = vsyncpa [#allocation4], 1 }
  0x44   :  { %166 = vsyncpa [#allocation5], 1 }

</bundles_post_ra>
